<compile_context>
chip_gen: v7x
topology: tpu7x:2x2x1
jax: 0.10.0
libtpu: 0.0.40
codegen_flags: <defaults>
</compile_context>

<pallas_src>
import jax
import jax.numpy as jnp
from jax.experimental import pallas as pl
from jax.experimental.pallas import tpu as pltpu


def _cdiv(a: int, b: int) -> int:
    return -(-a // b)


def _round_up(x: int, m: int) -> int:
    return _cdiv(x, m) * m


def _make_kernel(dims, p_pad: int, eps: float = 1e-5):
    """Fused MLP (+ReLU) + LayerNorm kernel for a fixed layer stack `dims`."""
    n_layers = len(dims) - 1
    latent_dim = dims[-1]
    inv_n = 1.0 / float(latent_dim)

    def kernel(x_ref, w_ref, v_ref, out_ref):
        # w_ref: (L, P, P) bf16, zero-padded; layer i lives in [i, :d_in, :d_out]
        # v_ref: (L+2, P) f32; rows 0..L-1 = biases, row L = gamma, row L+1 = beta
        vec = v_ref[...]                              # tiny; load once
        h = x_ref[...].astype(jnp.float32)            # (TB, n_cond) f32
        for i in range(n_layers):
            if i == 0:
                w = w_ref[0, :dims[0], :]             # (n_cond, P) bf16, static slice
            else:
                w = w_ref[i, :, :]                    # (P, P) bf16; pad lanes of h are 0
            # bf16 operands, f32 MXU accumulation; bias add + ReLU stay f32.
            h = jnp.dot(h.astype(jnp.bfloat16), w,
                        preferred_element_type=jnp.float32) + vec[i:i + 1, :]
            if i < n_layers - 1:
                h = jnp.maximum(h, 0.0)               # ReLU; dropout = identity (eval)

        # Full-width (128-lane) LayerNorm: pad lanes of h are exactly zero, so the
        # full-lane sum equals the real-lane sum.  Variance uses a masked centered
        # square; all VPU work is lane-dense f32, rsqrt goes to the EUP.
        lane = jax.lax.broadcasted_iota(jnp.int32, h.shape, dimension=1)
        mask = lane < latent_dim
        mean = jnp.sum(h, axis=-1, keepdims=True) * inv_n
        c = jnp.where(mask, h - mean, 0.0)
        var = jnp.sum(c * c, axis=-1, keepdims=True) * inv_n
        y = (h - mean) * jax.lax.rsqrt(var + eps)
        y = y * vec[n_layers:n_layers + 1, :] + vec[n_layers + 1:n_layers + 2, :]
        out_ref[...] = y[:, :latent_dim].astype(out_ref.dtype)

    return kernel


def pack_stats_encoder_params(weights, biases, gamma, beta):
    """One-time packing of per-layer params into two DMA-friendly tensors."""
    assert len(weights) == len(biases)
    n_layers = len(weights)
    dims = [int(weights[0].shape[0])] + [int(w.shape[1]) for w in weights]
    p_pad = _round_up(max(dims), 128)

    # Weights in bf16 (MXU operands); biases/gamma/beta stay f32 (epilogue).
    w_pack = jnp.zeros((n_layers, p_pad, p_pad), jnp.bfloat16)
    for i, w in enumerate(weights):
        w_pack = w_pack.at[i, : w.shape[0], : w.shape[1]].set(w.astype(jnp.bfloat16))

    v_pack = jnp.zeros((n_layers + 2, p_pad), jnp.float32)
    for i, b in enumerate(biases):
        v_pack = v_pack.at[i, : b.shape[0]].set(b.astype(jnp.float32))
    v_pack = v_pack.at[n_layers, : gamma.shape[0]].set(gamma.astype(jnp.float32))
    v_pack = v_pack.at[n_layers + 1, : beta.shape[0]].set(beta.astype(jnp.float32))
    return w_pack, v_pack, tuple(dims)


def stats_encoder_forward(x, w_pack, v_pack, dims, *, block_batch=1024,
                          single_shot_max=128, eps=1e-5):
    """x: (B, n_cond) f32.  w_pack/v_pack/dims from pack_stats_encoder_params."""
    dims = tuple(int(d) for d in dims)
    n_layers = len(dims) - 1
    latent_dim = dims[-1]
    n_cond = dims[0]
    B = int(x.shape[0])
    assert x.shape[1] == n_cond
    p_pad = int(w_pack.shape[-1])
    assert block_batch % 8 == 0, "batch tile must be a multiple of 8 sublanes"

    kernel = _make_kernel(dims, p_pad, eps)

    # FLOPs actually executed (padded contractions), not the logical MLP FLOPs.
    flops_per_row = 2 * (n_cond * p_pad + (n_layers - 1) * p_pad * p_pad) + 8 * p_pad
    param_bytes = int(w_pack.size) * w_pack.dtype.itemsize \
        + int(v_pack.size) * v_pack.dtype.itemsize

    def cost(batch):
        return pl.CostEstimate(
            flops=int(batch * flops_per_row),
            transcendentals=int(batch),                       # one rsqrt per row
            bytes_accessed=int(batch * (n_cond + latent_dim) * 4 + param_bytes),
        )

    if B <= single_shot_max:
        # Tiny batch: whole arrays VMEM-resident, no grid, no pipeline
        # double-buffering, 3 input DMAs total.
        return pl.pallas_call(
            kernel,
            out_shape=jax.ShapeDtypeStruct((B, latent_dim), jnp.float32),
            in_specs=[pl.BlockSpec(memory_space=pltpu.MemorySpace.VMEM)] * 3,
            out_specs=pl.BlockSpec(memory_space=pltpu.MemorySpace.VMEM),
            cost_estimate=cost(B),
        )(x, w_pack, v_pack)

    # Grid path: >=2 programs (v7x megacore), tile sized from B so tail padding
    # is bounded by <8 rows per program.  block_batch default (1024) keeps the
    # per-program working set ~1-2 MiB, well under every generation's VMEM.
    n_prog = max(2, _cdiv(B, block_batch))
    tb = min(block_batch, _round_up(_cdiv(B, n_prog), 8))
    grid = _cdiv(B, tb)
    b_pad = grid * tb
    if b_pad != B:
        # Zero rows are safe: LayerNorm is per-row, rsqrt(var+eps) stays finite,
        # and the rows are sliced off below.
        x = jnp.pad(x, ((0, b_pad - B), (0, 0)))
    out = pl.pallas_call(
        kernel,
        out_shape=jax.ShapeDtypeStruct((b_pad, latent_dim), jnp.float32),
        grid=(grid,),
        in_specs=[
            pl.BlockSpec((tb, n_cond), lambda i: (i, 0)),
            # Constant index_map -> parameter blocks stay resident across steps.
            pl.BlockSpec(w_pack.shape, lambda i: (0, 0, 0)),
            pl.BlockSpec(v_pack.shape, lambda i: (0, 0)),
        ],
        out_specs=pl.BlockSpec((tb, latent_dim), lambda i: (i, 0)),
        compiler_params=pltpu.CompilerParams(
            dimension_semantics=("parallel",),   # v7x: shard programs over both TCs
        ),
        cost_estimate=cost(b_pad),
    )(x, w_pack, v_pack)
    return out[:B] if b_pad != B else out


def _reference(x, weights, biases, gamma, beta, eps=1e-5):
    h = x
    for i, (w, b) in enumerate(zip(weights, biases)):
        h = h @ w + b
        if i < len(weights) - 1:
            h = jnp.maximum(h, 0.0)
    mean = jnp.mean(h, axis=-1, keepdims=True)
    var = jnp.mean((h - mean) ** 2, axis=-1, keepdims=True)
    return (h - mean) / jnp.sqrt(var + eps) * gamma + beta


if __name__ == "__main__":
    # StatsEncoder(hidden_dim=32, latent_dim=8, n_layers=3, n_cond=16), eval mode.
    B, n_cond, hidden_dim, latent_dim, n_layers = 8, 16, 32, 8, 3

    key = jax.random.PRNGKey(0)
    keys = jax.random.split(key, 2 * n_layers + 4)

    dims = [n_cond] + [hidden_dim] * (n_layers - 1) + [latent_dim]
    weights, biases = [], []
    for i in range(n_layers):
        weights.append(
            jax.random.normal(keys[2 * i], (dims[i], dims[i + 1]), jnp.float32) * 0.3)
        biases.append(
            jax.random.normal(keys[2 * i + 1], (dims[i + 1],), jnp.float32) * 0.05)
    gamma = 1.0 + 0.1 * jax.random.normal(keys[2 * n_layers], (latent_dim,), jnp.float32)
    beta = 0.05 * jax.random.normal(keys[2 * n_layers + 1], (latent_dim,), jnp.float32)

    w_pack, v_pack, packed_dims = pack_stats_encoder_params(weights, biases, gamma, beta)

    # Kernel uses bf16 MXU operands (f32 accumulate); vs. the f32 reference
    # expect ~1e-2-level agreement, so use a bf16-appropriate tolerance.
    TOL = dict(atol=5e-2, rtol=5e-2)

    # Path 1: tiny batch -> single-shot, no grid, whole-array VMEM residency.
    x_small = jax.random.normal(keys[2 * n_layers + 2], (B, n_cond), jnp.float32)
    out_small = jax.block_until_ready(
        stats_encoder_forward(x_small, w_pack, v_pack, packed_dims))
    ref_small = _reference(x_small, weights, biases, gamma, beta)
    assert out_small.shape == (B, latent_dim)
    assert jnp.allclose(out_small, ref_small, **TOL), "small-batch mismatch"

    # Path 2: grid path (forced) -> >=2 programs, adaptive tile, ragged tail
    #         padded by <8 rows (not a full tile).
    B2 = 40
    x_big = jax.random.normal(keys[2 * n_layers + 3], (B2, n_cond), jnp.float32)
    out_big = jax.block_until_ready(
        stats_encoder_forward(x_big, w_pack, v_pack, packed_dims,
                              block_batch=16, single_shot_max=0))
    ref_big = _reference(x_big, weights, biases, gamma, beta)
    assert out_big.shape == (B2, latent_dim)
    assert jnp.allclose(out_big, ref_big, **TOL), "tiled-batch mismatch"

    print("KERNEL_OK")
</pallas_src>

<mosaic_0001>
module attributes {stable_mosaic.version = 11 : i64} {
  func.func @kernel(%arg0: memref<8x16xf32, #tpu.memory_space<vmem>>, %arg1: memref<3x128x128xbf16, #tpu.memory_space<vmem>>, %arg2: memref<5x128xf32, #tpu.memory_space<vmem>>, %arg3: memref<8x8xf32, #tpu.memory_space<vmem>>) attributes {dimension_semantics = [], scalar_prefetch = 0 : i64, scratch_operands = 0 : i64, tpu.core_type = #tpu.core_type<tc>} {
    %c0 = arith.constant 0 : index
    %c0_0 = arith.constant 0 : index
    %0 = vector.load %arg2[%c0, %c0_0] : memref<5x128xf32, #tpu.memory_space<vmem>>, vector<5x128xf32>
    %c0_1 = arith.constant 0 : index
    %c0_2 = arith.constant 0 : index
    %1 = vector.load %arg0[%c0_1, %c0_2] : memref<8x16xf32, #tpu.memory_space<vmem>>, vector<8x16xf32>
    %c0_3 = arith.constant 0 : index
    %c0_4 = arith.constant 0 : index
    %c0_5 = arith.constant 0 : index
    %2 = vector.load %arg1[%c0_3, %c0_4, %c0_5] : memref<3x128x128xbf16, #tpu.memory_space<vmem>>, vector<1x16x128xbf16>
    %3 = vector.shape_cast %2 : vector<1x16x128xbf16> to vector<16x128xbf16>
    %4 = arith.truncf %1 : vector<8x16xf32> to vector<8x16xbf16>
    %cst = arith.constant dense<0.000000e+00> : vector<8x128xf32>
    %5 = tpu.matmul %4, %3, %cst {dimension_numbers = #tpu.dot_dimension_numbers<[1], [0], [0], [1], [0, 0, 1, 1], [], []>} : vector<8x16xbf16>, vector<16x128xbf16>, vector<8x128xf32> -> vector<8x128xf32>
    %6 = vector.extract_strided_slice %0 {offsets = [0, 0], sizes = [1, 128], strides = [1, 1]} : vector<5x128xf32> to vector<1x128xf32>
    %7 = vector.broadcast %6 : vector<1x128xf32> to vector<8x128xf32>
    %8 = arith.addf %5, %7 : vector<8x128xf32>
    %cst_6 = arith.constant 0.000000e+00 : f32
    %9 = vector.broadcast %cst_6 : f32 to vector<8x128xf32>
    %10 = arith.maximumf %8, %9 : vector<8x128xf32>
    %c1 = arith.constant 1 : index
    %c0_7 = arith.constant 0 : index
    %c0_8 = arith.constant 0 : index
    %11 = vector.load %arg1[%c1, %c0_7, %c0_8] : memref<3x128x128xbf16, #tpu.memory_space<vmem>>, vector<1x128x128xbf16>
    %12 = vector.shape_cast %11 : vector<1x128x128xbf16> to vector<128x128xbf16>
    %13 = arith.truncf %10 : vector<8x128xf32> to vector<8x128xbf16>
    %cst_9 = arith.constant dense<0.000000e+00> : vector<8x128xf32>
    %14 = tpu.matmul %13, %12, %cst_9 {dimension_numbers = #tpu.dot_dimension_numbers<[1], [0], [0], [1], [0, 0, 1, 1], [], []>} : vector<8x128xbf16>, vector<128x128xbf16>, vector<8x128xf32> -> vector<8x128xf32>
    %15 = vector.extract_strided_slice %0 {offsets = [1, 0], sizes = [1, 128], strides = [1, 1]} : vector<5x128xf32> to vector<1x128xf32>
    %16 = vector.broadcast %15 : vector<1x128xf32> to vector<8x128xf32>
    %17 = arith.addf %14, %16 : vector<8x128xf32>
    %cst_10 = arith.constant 0.000000e+00 : f32
    %18 = vector.broadcast %cst_10 : f32 to vector<8x128xf32>
    %19 = arith.maximumf %17, %18 : vector<8x128xf32>
    %c2 = arith.constant 2 : index
    %c0_11 = arith.constant 0 : index
    %c0_12 = arith.constant 0 : index
    %20 = vector.load %arg1[%c2, %c0_11, %c0_12] : memref<3x128x128xbf16, #tpu.memory_space<vmem>>, vector<1x128x128xbf16>
    %21 = vector.shape_cast %20 : vector<1x128x128xbf16> to vector<128x128xbf16>
    %22 = arith.truncf %19 : vector<8x128xf32> to vector<8x128xbf16>
    %cst_13 = arith.constant dense<0.000000e+00> : vector<8x128xf32>
    %23 = tpu.matmul %22, %21, %cst_13 {dimension_numbers = #tpu.dot_dimension_numbers<[1], [0], [0], [1], [0, 0, 1, 1], [], []>} : vector<8x128xbf16>, vector<128x128xbf16>, vector<8x128xf32> -> vector<8x128xf32>
    %24 = vector.extract_strided_slice %0 {offsets = [2, 0], sizes = [1, 128], strides = [1, 1]} : vector<5x128xf32> to vector<1x128xf32>
    %25 = vector.broadcast %24 : vector<1x128xf32> to vector<8x128xf32>
    %26 = arith.addf %23, %25 : vector<8x128xf32>
    %27 = tpu.iota {dimensions = array<i32: 1>} : vector<8x128xi32>
    %c8_i32 = arith.constant 8 : i32
    %28 = vector.broadcast %c8_i32 : i32 to vector<8x128xi32>
    %29 = arith.cmpi slt, %27, %28 : vector<8x128xi32>
    %cst_14 = arith.constant dense<0.000000e+00> : vector<8xf32>
    %30 = vector.multi_reduction <add>, %26, %cst_14 [1] : vector<8x128xf32> to vector<8xf32>
    %31 = vector.shape_cast %30 : vector<8xf32> to vector<8x1xf32>
    %cst_15 = arith.constant 1.250000e-01 : f32
    %32 = vector.broadcast %cst_15 : f32 to vector<8x1xf32>
    %33 = arith.mulf %31, %32 : vector<8x1xf32>
    %34 = vector.broadcast %33 : vector<8x1xf32> to vector<8x128xf32>
    %35 = arith.subf %26, %34 : vector<8x128xf32>
    %cst_16 = arith.constant 0.000000e+00 : f32
    %36 = vector.broadcast %cst_16 : f32 to vector<8x128xf32>
    %37 = arith.select %29, %35, %36 : vector<8x128xi1>, vector<8x128xf32>
    %38 = arith.mulf %37, %37 : vector<8x128xf32>
    %cst_17 = arith.constant dense<0.000000e+00> : vector<8xf32>
    %39 = vector.multi_reduction <add>, %38, %cst_17 [1] : vector<8x128xf32> to vector<8xf32>
    %40 = vector.shape_cast %39 : vector<8xf32> to vector<8x1xf32>
    %cst_18 = arith.constant 1.250000e-01 : f32
    %41 = vector.broadcast %cst_18 : f32 to vector<8x1xf32>
    %42 = arith.mulf %40, %41 : vector<8x1xf32>
    %43 = vector.broadcast %33 : vector<8x1xf32> to vector<8x128xf32>
    %44 = arith.subf %26, %43 : vector<8x128xf32>
    %cst_19 = arith.constant 9.99999974E-6 : f32
    %45 = vector.broadcast %cst_19 : f32 to vector<8x1xf32>
    %46 = arith.addf %42, %45 : vector<8x1xf32>
    %47 = math.rsqrt %46 : vector<8x1xf32>
    %48 = vector.broadcast %47 : vector<8x1xf32> to vector<8x128xf32>
    %49 = arith.mulf %44, %48 : vector<8x128xf32>
    %50 = vector.extract_strided_slice %0 {offsets = [3, 0], sizes = [1, 128], strides = [1, 1]} : vector<5x128xf32> to vector<1x128xf32>
    %51 = vector.broadcast %50 : vector<1x128xf32> to vector<8x128xf32>
    %52 = arith.mulf %49, %51 : vector<8x128xf32>
    %53 = vector.extract_strided_slice %0 {offsets = [4, 0], sizes = [1, 128], strides = [1, 1]} : vector<5x128xf32> to vector<1x128xf32>
    %54 = vector.broadcast %53 : vector<1x128xf32> to vector<8x128xf32>
    %55 = arith.addf %52, %54 : vector<8x128xf32>
    %56 = vector.extract_strided_slice %55 {offsets = [0, 0], sizes = [8, 8], strides = [1, 1]} : vector<8x128xf32> to vector<8x8xf32>
    %c0_20 = arith.constant 0 : index
    %c0_21 = arith.constant 0 : index
    %57 = vector.load %arg3[%c0_20, %c0_21] : memref<8x8xf32, #tpu.memory_space<vmem>>, vector<8x8xf32>
    tpu.vector_store %arg3[%c0_20, %c0_21], %56 {strides = array<i32>} : memref<8x8xf32, #tpu.memory_space<vmem>>, vector<8x8xf32>,
    return
  }
}

</mosaic_0001>

<bundles_post_ra>
// kernel: tpu_custom_call.1
= control target key start
LH: loop header
LB: loop body
LE: loop exit
PB: predicated region body
PF: predicated region fallthrough
CT: control target
= control target key end

     0   :  { %8 = vsyncpa [#allocation3], 0  ;;  %s678_s0 = inlined_call_operand.hbm [shape: f32[8,16], index: 0, kind: input, shape index: {}]   ;;  %s679_s1 = inlined_call_operand.hbm [shape: bf16[3,128,128], index: 1, kind: input, shape index: {}]   ;;  %s680_s2 = inlined_call_operand.hbm [shape: f32[5,128], index: 2, kind: input, shape index: {}]   ;;  %s681_s3 = inlined_call_operand.hbm [shape: f32[8,8], index: 3, kind: output, shape index: {}]  }
   0x1   :  { %9 = vsyncpa [#allocation6], 0 }
   0x2   :  { %10 = vsyncpa [#allocation4], 0  ;;  %s582_s12 = smov [#allocation5]   ;;  %s488_s16 = scalar_lea.hbm %s679_s1, 3072 }
   0x3   :  { %s26_s13 = sshll.u32 %s582_s12, 4  ;;  %p489_p0 = scmp.ne.s32.totalorder %s679_s1, %s488_s16  ;;  %s27_s13 = int_to_ptr.vmem [resolvable:$true] %s26_s13 }
   0x4   :  { %p492_p1 = scmp.lt.u32.totalorder %s488_s16, %s679_s1 }
   0x6   :  { %p494_p2 = pnand %p492_p1, %p489_p0 }
   0x8   :  { %497 = shalt.err (!%p494_p2)
}
   0x9   :  { %s498_s21 = scalar_lea.vmem %s27_s13, 3072  ;;  %p503_p4 = scmp.lt.s32.totalorder %s27_s13, %s27_s13 }
   0xa   :  { %p499_p3 = scmp.ne.s32.totalorder %s27_s13, %s498_s21  ;;  %p504_p5 = scmp.lt.s32.totalorder %s498_s21, %s498_s21 }
   0xc   :  { %p505_p6 = por %p504_p5, %p503_p4 }
   0xe   :  { %p506_p7 = pnand %p505_p6, %p499_p3 }
  0x10   :  { %509 = shalt.err (!%p506_p7)
}
  0x11   :  { %s583_s22 = smov 64   ;;  %s584_s23 = smov 4  }
  0x12   :  { %32 = dma.hbm_to_vmem [thread:$0]  %s679_s1, 3072, %s27_s13, [#allocation6], %s583_s22, %s583_s22, %s584_s23  }
  0x13   :  { %s585_s26 = smov [#allocation2]   ;;  %s586_s28 = smov [#allocation7]  }
  0x14   :  { %s17_s27 = sshll.u32 %s585_s26, 4  ;;  %s39_s29 = sshll.u32 %s586_s28, 4  ;;  %s18_s27 = int_to_ptr.vmem [resolvable:$true] %s17_s27  ;;  %s40_s29 = int_to_ptr.vmem [resolvable:$true] %s39_s29 }
  0x15   :  { %s510_s5 = scalar_lea.hbm %s678_s0, 128 }
  0x16   :  { %p511_p8 = scmp.ne.s32.totalorder %s678_s0, %s510_s5  ;;  %p514_p9 = scmp.lt.u32.totalorder %s510_s5, %s678_s0 }
  0x18   :  { %p516_p10 = pnand %p514_p9, %p511_p8 }
  0x1a   :  { %519 = shalt.err (!%p516_p10)
}
  0x1b   :  { %s520_s1 = scalar_lea.vmem %s18_s27, 128  ;;  %p525_p12 = scmp.lt.s32.totalorder %s18_s27, %s18_s27 }
  0x1c   :  { %p521_p11 = scmp.ne.s32.totalorder %s18_s27, %s520_s1  ;;  %p526_p13 = scmp.lt.s32.totalorder %s520_s1, %s520_s1 }
  0x1e   :  { %p527_p0 = por %p526_p13, %p525_p12 }
  0x20   :  { %p528_p1 = pnand %p527_p0, %p521_p11 }
  0x22   :  { %531 = shalt.err (!%p528_p1)
}
  0x23   :  { %20 = dma.hbm_to_vmem [thread:$0]  %s678_s0, 128, %s18_s27, [#allocation3]  }
  0x24   :  { %s532_s14 = scalar_lea.hbm %s680_s2, 128 }
  0x25   :  { %p533_p2 = scmp.ne.s32.totalorder %s680_s2, %s532_s14  ;;  %p536_p3 = scmp.lt.u32.totalorder %s532_s14, %s680_s2 }
  0x27   :  { %p538_p4 = pnand %p536_p3, %p533_p2 }
  0x29   :  { %541 = shalt.err (!%p538_p4)
}
  0x2a   :  { %s542_s19 = scalar_lea.vmem %s40_s29, 128  ;;  %p547_p6 = scmp.lt.s32.totalorder %s40_s29, %s40_s29 }
  0x2b   :  { %p543_p5 = scmp.ne.s32.totalorder %s40_s29, %s542_s19  ;;  %p548_p7 = scmp.lt.s32.totalorder %s542_s19, %s542_s19 }
  0x2d   :  { %p549_p8 = por %p548_p7, %p547_p6 }
  0x2f   :  { %p550_p9 = pnand %p549_p8, %p543_p5 }
  0x31   :  { %553 = shalt.err (!%p550_p9)
}
  0x32   :  { %42 = dma.hbm_to_vmem [thread:$0]  %s680_s2, 128, %s40_s29, [#allocation6]  }
  0x33   :  { %576 = dma.done.wait [#allocation3], 128  }
  0x34   :  { %577 = vsyncadd [#allocation3], 4294967168 }
  0x35   :  { %578 = dma.done.wait [#allocation6], 3200  }
  0x36   :  { %579 = vsyncadd [#allocation6], 4294964096  ;;  %v587_v0 = vmov 0.0   ;;  %vm588_vm0 = vmmov 0   ;;  %v469_v1 = vld [vmem:[#allocation5] sm:$0xff]   ;;  %v54_v2 = vld [vmem:[#allocation2] sm:$0xff]  ;;  %v58_v18 = vlaneseq }
  0x37   :  { %415 = vmatprep.subr.bf16.mxu0 %v587_v0  ;;  %417 = vmatprep.mubr.msk.bf16.mxu0 %vm588_vm0, %v587_v0  ;;  %v57_v3 = vpack.c.bf16 %v54_v2, %v54_v2  ;;  %vm68_vm1 = vcmask 130048   ;;  %v470_v4 = vld [vmem:[#allocation5 + $0x40] sm:$0xff]   ;;  %v471_v5 = vld [vmem:[#allocation5 + $0x48] sm:$0xff]   ;;  %v472_v6 = vld [vmem:[#allocation5 + $0x50] sm:$0xff]   ;;  %s589_s2 = smov [#allocation8]   ;;  %vm359_vm3 = vcmask 64512  }
  0x38   :  { %421 = vmatprep.subr.bf16.mxu1 %v587_v0  ;;  %437 = vmatprep.mubr.msk.bf16.mxu1 %vm588_vm0, %v587_v0  ;;  %v473_v7 = vld [vmem:[#allocation5 + $0x58] sm:$0xff]   ;;  %v474_v8 = vld [vmem:[#allocation5 + $0x60] sm:$0xff]   ;;  %v475_v9 = vld [vmem:[#allocation5 + $0x68] sm:$0xff]   ;;  %v59_v19 = vshrl.u32 %v58_v18, 7  ;;  %v335_v48 = vand.u32 127, %v58_v18  ;;  %s367_s21 = sshll.u32 %s589_s2, 4  ;;  %s368_s21 = int_to_ptr.vmem [resolvable:$true] %s367_s21 }
  0x39   :  { %416 = vmatpush3.bf16.msra.mxu0 %v469_v1  ;;  %422 = vmatpush3.bf16.msra.mxu1 %v470_v4  ;;  %v476_v10 = vld [vmem:[#allocation5 + $0x70] sm:$0xff]   ;;  %v477_v11 = vld [vmem:[#allocation5 + $0x78] sm:$0xff]   ;;  %v478_v12 = vld [vmem:[#allocation5 + $0x80] sm:$0xff]   ;;  %s554_s22 = scalar_lea.vmem %s368_s21, 128  ;;  %p559_p11 = scmp.lt.s32.totalorder %s368_s21, %s368_s21 }
  0x3a   :  { %441 = vmatprep.subr.bf16.mxu0 %v587_v0  ;;  %423 = vmatprep.subr.bf16.mxu1 %v587_v0  ;;  %v479_v13 = vld [vmem:[#allocation5 + $0x88] sm:$0xff]   ;;  %v480_v14 = vld [vmem:[#allocation5 + $0x90] sm:$0xff]   ;;  %v481_v15 = vld [vmem:[#allocation5 + $0x98] sm:$0xff]   ;;  %v60_v20 = vsub.s32 0, %v59_v19  ;;  %v133_v32 = vsub.s32 1, %v59_v19  ;;  %v244_v41 = vsub.s32 2, %v59_v19  ;;  %p555_p10 = scmp.ne.s32.totalorder %s368_s21, %s554_s22  ;;  %p560_p12 = scmp.lt.s32.totalorder %s554_s22, %s554_s22 }
  0x3b   :  { %v482_v16 = vld [vmem:[#allocation5 + $0xa0] sm:$0xff]   ;;  %v483_v17 = vld [vmem:[#allocation5 + $0xa8] sm:$0xff]   ;;  %v484_v30 = vld [vmem:[#allocation5 + $0xb0] sm:$0xff]   ;;  %vm336_vm2 = vcmp.lt.s32.totalorder %v335_v48, 8  ;;  %v351_v57 = vsub.s32 3, %v59_v19  ;;  %v356_v58 = vsub.s32 4, %v59_v19 }
  0x3c   :  { %418 = vmatmul.mubr.msk.bf16.vlgmr.msra.gmra.mrb[0].mxu0 %vm68_vm1, %v57_v3  ;;  %v53_v21 = vld [vmem:[#allocation7] sm:$0x1f]  ;;  %v485_v31 = vld [vmem:[#allocation5 + $0xb8] sm:$0xff]   ;;  %p561_p13 = por %p560_p12, %p559_p11 }
  0x3d   :  { %457 = vmatprep.mubr.msk.bf16.mxu0 %vm588_vm0, %v587_v0  ;;  %424 = vmatpush3.bf16.msra.mxu1 %v471_v5  ;;  %v61_v22 = vrot.slane %v53_v21, %v60_v20  ;;  %v134_v33 = vrot.slane %v53_v21, %v133_v32  ;;  %v245_v42 = vrot.slane %v53_v21, %v244_v41 }
  0x3e   :  { %425 = vmatprep.subr.bf16.mxu1 %v587_v0  ;;  %442 = vmatpush3.bf16.msra.mxu0 %v478_v12  ;;  %v352_v59 = vrot.slane %v53_v21, %v351_v57  ;;  %v357_v62 = vrot.slane %v53_v21, %v356_v58  ;;  %p562_p0 = pnand %p561_p13, %p555_p10 }
  0x3f   :  { %443 = vmatprep.subr.bf16.mxu0 %v587_v0 }
  0x41   :  { %426 = vmatpush3.bf16.msra.mxu1 %v472_v6 }
  0x42   :  { %427 = vmatprep.subr.bf16.mxu1 %v587_v0  ;;  %444 = vmatpush3.bf16.msra.mxu0 %v479_v13 }
  0x43   :  { %445 = vmatprep.subr.bf16.mxu0 %v587_v0 }
  0x45   :  { %428 = vmatpush3.bf16.msra.mxu1 %v473_v7 }
  0x46   :  { %429 = vmatprep.subr.bf16.mxu1 %v587_v0  ;;  %446 = vmatpush3.bf16.msra.mxu0 %v480_v14 }
  0x47   :  { %447 = vmatprep.subr.bf16.mxu0 %v587_v0 }
  0x49   :  { %430 = vmatpush3.bf16.msra.mxu1 %v474_v8 }
  0x4a   :  { %431 = vmatprep.subr.bf16.mxu1 %v587_v0  ;;  %448 = vmatpush3.bf16.msra.mxu0 %v481_v15 }
  0x4b   :  { %449 = vmatprep.subr.bf16.mxu0 %v587_v0 }
  0x4d   :  { %432 = vmatpush3.bf16.msra.mxu1 %v475_v9 }
  0x4e   :  { %433 = vmatprep.subr.bf16.mxu1 %v587_v0  ;;  %450 = vmatpush3.bf16.msra.mxu0 %v482_v16 }
  0x4f   :  { %451 = vmatprep.subr.bf16.mxu0 %v587_v0 }
  0x51   :  { %434 = vmatpush3.bf16.msra.mxu1 %v476_v10 }
  0x52   :  { %435 = vmatprep.subr.bf16.mxu1 %v587_v0  ;;  %452 = vmatpush3.bf16.msra.mxu0 %v483_v17 }
  0x53   :  { %453 = vmatprep.subr.bf16.mxu0 %v587_v0 }
  0x55   :  { %436 = vmatpush3.bf16.msra.mxu1 %v477_v11 }
  0x56   :  { %454 = vmatpush3.bf16.msra.mxu0 %v484_v30 }
  0x57   :  { %455 = vmatprep.subr.bf16.mxu0 %v587_v0 }
  0x5a   :  { %456 = vmatpush3.bf16.msra.mxu0 %v485_v31 }
 0x10f   :  { %v106_v23 = vpop.f32.mrb[0].mxu0 }
 0x110   :  { %v107_v24 = vadd.f32 %v106_v23, %v61_v22  ;;  %v419_v25 = vpop.f32.mrb[1].mxu0 }
 0x111   :  { %v109_v26 = vpop.f32.mrb[2].mxu0 }
 0x112   :  { %v112_v27 = vmax.f32 %v107_v24, 0.0  ;;  %v420_v28 = vpop.f32.mrb[3].mxu0 }
 0x114   :  { %v130_v29 = vpack.c.bf16 %v112_v27, %v112_v27 }
 0x116   :  { %438 = vmatmul.mubr.bf16.vlgmr.msra.gmra.mrb[0].mxu1 %v130_v29 }
 0x1e9   :  { %v217_v34 = vpop.f32.mrb[0].mxu1 }
 0x1ea   :  { %v218_v35 = vadd.f32 %v217_v34, %v134_v33  ;;  %v439_v36 = vpop.f32.mrb[1].mxu1 }
 0x1eb   :  { %v220_v37 = vpop.f32.mrb[2].mxu1 }
 0x1ec   :  { %v223_v38 = vmax.f32 %v218_v35, 0.0  ;;  %v440_v39 = vpop.f32.mrb[3].mxu1 }
 0x1ee   :  { %v241_v40 = vpack.c.bf16 %v223_v38, %v223_v38 }
 0x1f0   :  { %458 = vmatmul.mubr.bf16.vlgmr.msra.gmra.mrb[4].mxu0 %v241_v40 }
 0x2c3   :  { %v328_v43 = vpop.f32.mrb[4].mxu0 }
 0x2c4   :  { %v329_v44 = vadd.f32 %v328_v43, %v245_v42  ;;  %v459_v45 = vpop.f32.mrb[5].mxu0 }
 0x2c5   :  { %v331_v46 = vpop.f32.mrb[6].mxu0 }
 0x2c6   :  { %337 = vadd.xlane.f32.xlu0 %v329_v44  ;;  %v460_v47 = vpop.f32.mrb[7].mxu0 }
 0x353   :  { %v338_v49 = vpop.xlane.xlu0 %337 }
 0x354   :  { %v339_v50 = vmul.f32 0.125, %v338_v49 }
 0x356   :  { %v340_v51 = vsub.f32 %v329_v44, %v339_v50 }
 0x358   :  { %v341_v52 = vsel %vm336_vm2, %v340_v51, 0.0 }
 0x359   :  { %v342_v53 = vmul.f32 %v341_v52, %v341_v52 }
 0x35b   :  { %343 = vadd.xlane.f32.xlu0 %v342_v53 }
 0x3e8   :  { %v344_v54 = vpop.xlane.xlu0 %343 }
 0x3e9   :  { %v345_v55 = vmul.f32 0.125, %v344_v54 }
 0x3eb   :  { %v346_v56 = vadd.f32 1e-05, %v345_v55 }
 0x3ed   :  { %486 = vrsqrt.f32 %v346_v56 }
 0x3f7   :  { %v487_v60 = vpop.eup %486 }
 0x3f8   :  { %v348_v61 = vmul.f32 %v487_v60, %v340_v51 }
 0x3fa   :  { %v353_v63 = vmul.f32 %v352_v59, %v348_v61 }
 0x3fc   :  { %v358_v0 = vadd.f32 %v357_v62, %v353_v63 }
 0x3fe   :  { %360 = vst.msk [vmem:[#allocation8] sm:$0xff] %vm359_vm3, %v358_v0 }
 0x3ff   :  { %565 = shalt.err (!%p562_p0)
}
 0x400   :  { %s566_s25 = scalar_lea.hbm %s681_s3, 128 }
 0x401   :  { %p567_p1 = scmp.ne.s32.totalorder %s681_s3, %s566_s25  ;;  %p570_p2 = scmp.lt.u32.totalorder %s566_s25, %s681_s3 }
 0x403   :  { %p572_p3 = pnand %p570_p2, %p567_p1 }
 0x405   :  { %575 = shalt.err (!%p572_p3)
}
 0x406   :  { %370 = dma.vmem_to_hbm [thread:$0]  %s368_s21, 128, %s681_s3, [#allocation4]  }
 0x407   :  { %580 = dma.done.wait [#allocation4], 128  }
 0x408   :  { %581 = vsyncadd [#allocation4], 4294967168 }
 0x409   :  { %374 = vsyncpa [#allocation3], 1 }
 0x40a   :  { %375 = vsyncpa [#allocation6], 1 }
 0x40b   :  { %376 = vsyncpa [#allocation4], 1 }

</bundles_post_ra>
